<compile_context>
chip_gen: v6e
topology: v6e:2x2x1
jax: 0.10.0
libtpu: 0.0.40
codegen_flags: <defaults>
</compile_context>

<pallas_src>
import numpy as np
import jax
import jax.numpy as jnp
from jax.experimental import pallas as pl
from jax.experimental.pallas import tpu as pltpu


def st_gcn_forward(x, A, params, *, nb=None):
    """st_gcn forward (eval mode) as a single lane-dense Pallas TPU kernel."""
    N, Cin, T, V = x.shape
    K = A.shape[0]
    W1, b1 = params["W1"], params["b1"]
    s1, t1 = params["s1"], params["t1"]
    prelu = params["prelu"]
    W2, b2 = params["W2"], params["b2"]
    s2, t2 = params["s2"], params["t2"]
    Cout = W2.shape[0]
    kt = W2.shape[2]
    pad = (kt - 1) // 2
    TV = T * V
    assert Cin == Cout, "identity residual path requires in_channels == out_channels"

    # Batch block per grid step. One step covers the whole (tiny) batch here; for
    # large N pick nb so nb*Cin % 8 == 0 and N//nb is even so both v7x TensorCores
    # get work on the "parallel" batch axis.
    if nb is None:
        nb = N
    assert N % nb == 0
    num_blocks = N // nb

    f32 = jnp.float32
    eye_nb = jnp.eye(nb, dtype=f32)
    rows = nb * Cout

    # ---- fold weights into block forms matching the (row=(n,c), lane=(t,v)) layout ----
    # GCN 1x1 conv with BN1 scale folded in: rows ordered (k, n, c); cols (n', ci).
    W1k = W1.reshape(K, Cout, Cin).astype(f32)
    W1s = s1.astype(f32)[None, :, None] * W1k
    W1big = jnp.concatenate([jnp.kron(eye_nb, W1s[k]) for k in range(K)], axis=0)  # (K*rows, nb*Cin)

    # GCN bias (scaled by s1) pushed through the graph contraction + BN1 shift ->
    # one additive (rows, TV) term. kron(I_T, A_k) column sums = sum_v A[k,v,w] (t-independent).
    b1k = b1.reshape(K, Cout).astype(f32)
    Acolsum = A.astype(f32).sum(axis=1)                                           # (K, V)
    bias_graph = s1.astype(f32)[:, None] * jnp.einsum("kc,kw->cw", b1k, Acolsum)  # (Cout, V)
    aff1 = jnp.tile(bias_graph[:, None, :], (1, T, 1)).reshape(Cout, TV) \
        + t1.astype(f32)[:, None]                                                 # (Cout, TV)
    aff1big = jnp.tile(aff1, (nb, 1))                                             # (rows, TV)

    # Graph contraction: block-diagonal (over t) copies of A[k] acting on the (t,v) lane dim.
    Abig = jnp.stack([jnp.kron(jnp.eye(T, dtype=f32), A[k].astype(f32))
                      for k in range(K)])                                         # (K, TV, TV)

    # Temporal conv with BN2 scale folded in: one matmul against a (kt*rows, TV) im2col
    # stack (rows ordered (dt, n, ci)); conv bias + BN2 shift collapse into one column.
    W2s = s2.astype(f32)[:, None, None] * W2.astype(f32)                          # (Cout, Cout, kt)
    W2big = jnp.concatenate([jnp.kron(eye_nb, W2s[:, :, dt]) for dt in range(kt)], axis=1)
    aff2 = s2.astype(f32) * b2.astype(f32) + t2.astype(f32)
    aff2big = jnp.tile(aff2, (nb,)).reshape(rows, 1)

    x2d = x.astype(f32).reshape(N * Cin, TV)        # rows (n, ci), lanes (t, v) -- lane dense

    def kernel(x_ref, abig_ref, w1_ref, aff1_ref, pr_ref, w2_ref, aff2_ref, out_ref):
        xb = x_ref[...]                                            # (nb*Cin, TV) f32

        # ---- GCN: 1x1 conv over channels (BN1 scale pre-folded) -> one MXU matmul ----
        # TODO(synk): on v6e/v7x the matmul operands could be cast to bf16 for full MXU
        #             rate; kept f32 to stay comfortably inside the 1e-3 reference tolerance.
        y = jnp.dot(w1_ref[...], xb, preferred_element_type=jnp.float32)   # (K*rows, TV)

        # ---- graph contraction + folded (bias@A + BN1 shift): accumulate into aff1 ----
        z = aff1_ref[...]
        for k in range(K):                                         # K == 3, static unroll
            z = z + jnp.dot(y[k * rows:(k + 1) * rows, :], abig_ref[k],
                            preferred_element_type=jnp.float32)

        # ---- PReLU (single shared slope) ----
        a = pr_ref[0]
        z = jnp.where(z >= 0.0, z, a * z)

        # ---- TCN: (kt x 1) temporal conv as im2col (lane shifts, zero boundary) + one matmul ----
        def tap(s):
            # tap(s)[(n,c), (t,w)] == z[(n,c), (t+s,w)]; zero outside [0, T). Lane shift by s*V.
            if s == 0:
                return z
            zeros = jnp.zeros((rows, abs(s) * V), jnp.float32)
            if s > 0:
                return jnp.concatenate([z[:, s * V:], zeros], axis=1)
            return jnp.concatenate([zeros, z[:, :s * V]], axis=1)

        zstack = jnp.concatenate([tap(dt - pad) for dt in range(kt)], axis=0)  # (kt*rows, TV)
        o = jnp.dot(w2_ref[...], zstack, preferred_element_type=jnp.float32) + aff2_ref[...]

        # ---- Dropout(p=0)=identity + identity residual + LeakyReLU(0.01) ----
        o = o + xb                                   # residual: Cin == Cout, stride == 1
        out_ref[...] = jnp.where(o >= 0.0, o, 0.01 * o)

    out2d = pl.pallas_call(
        kernel,
        out_shape=jax.ShapeDtypeStruct((N * Cout, TV), jnp.float32),
        grid_spec=pltpu.PrefetchScalarGridSpec(
            num_scalar_prefetch=0,
            grid=(num_blocks,),
            in_specs=[
                pl.BlockSpec((nb * Cin, TV), lambda n: (n, 0)),               # x (lane-dense block)
                pl.BlockSpec((K, TV, TV), lambda n: (0, 0, 0)),               # Abig
                pl.BlockSpec((K * nb * Cout, nb * Cin), lambda n: (0, 0)),    # W1big (s1-folded)
                pl.BlockSpec((nb * Cout, TV), lambda n: (0, 0)),              # aff1big
                pl.BlockSpec(memory_space=pltpu.MemorySpace.SMEM),            # PReLU slope (scalar)
                pl.BlockSpec((nb * Cout, kt * nb * Cout), lambda n: (0, 0)),  # W2big (s2-folded)
                pl.BlockSpec((nb * Cout, 1), lambda n: (0, 0)),               # aff2big
            ],
            out_specs=pl.BlockSpec((nb * Cout, TV), lambda n: (n, 0)),        # lane-dense output
        ),
        compiler_params=pltpu.CompilerParams(dimension_semantics=("parallel",)),
    )(x2d, Abig, W1big, aff1big, prelu.astype(f32), W2big, aff2big)

    out = out2d.reshape(N, Cout, T, V)
    return out, A   # matches PyTorch module: returns (x, A)


def ref_forward(x, A, W1, b1, s1, t1, a, W2, b2, s2, t2):
    # Pure numpy reference (float64) of the st_gcn forward pass in eval mode.
    x = x.astype(np.float64); A = A.astype(np.float64)
    N, Cin, T, V = x.shape
    K = A.shape[0]
    Cout = W1.shape[0] // K
    kt = W2.shape[2]
    pad = (kt - 1) // 2
    y = np.einsum("oc,nctv->notv", W1, x) + b1[None, :, None, None]
    y = y.reshape(N, K, Cout, T, V)
    z = np.einsum("nkctv,kvw->nctw", y, A)
    z = z * s1[None, :, None, None] + t1[None, :, None, None]
    z = np.where(z >= 0, z, a * z)
    zp = np.pad(z, ((0, 0), (0, 0), (pad, pad), (0, 0)))
    out = np.zeros((N, Cout, T, V), np.float64)
    for dt in range(kt):
        out += np.einsum("oc,nctv->notv", W2[:, :, dt], zp[:, :, dt:dt + T, :])
    out += b2[None, :, None, None]
    out = out * s2[None, :, None, None] + t2[None, :, None, None]
    out = out + x                       # identity residual
    out = np.where(out >= 0, out, 0.01 * out)
    return out.astype(np.float32)


def make_params(key, Cin, Cout, K, kt):
    eps = 1e-5
    ks = jax.random.split(key, 14)
    W1 = 0.3 * jax.random.normal(ks[0], (K * Cout, Cin), jnp.float32)
    b1 = 0.1 * jax.random.normal(ks[1], (K * Cout,), jnp.float32)
    g1 = 1.0 + 0.1 * jax.random.normal(ks[2], (Cout,), jnp.float32)
    be1 = 0.1 * jax.random.normal(ks[3], (Cout,), jnp.float32)
    m1 = 0.1 * jax.random.normal(ks[4], (Cout,), jnp.float32)
    v1 = 1.0 + 0.1 * jnp.abs(jax.random.normal(ks[5], (Cout,), jnp.float32))
    s1 = g1 / jnp.sqrt(v1 + eps)
    t1 = be1 - m1 * s1
    prelu = jnp.array([0.25], jnp.float32)          # nn.PReLU() default init
    W2 = 0.3 * jax.random.normal(ks[6], (Cout, Cout, kt), jnp.float32)
    b2 = 0.1 * jax.random.normal(ks[7], (Cout,), jnp.float32)
    g2 = 1.0 + 0.1 * jax.random.normal(ks[8], (Cout,), jnp.float32)
    be2 = 0.1 * jax.random.normal(ks[9], (Cout,), jnp.float32)
    m2 = 0.1 * jax.random.normal(ks[10], (Cout,), jnp.float32)
    v2 = 1.0 + 0.1 * jnp.abs(jax.random.normal(ks[11], (Cout,), jnp.float32))
    s2 = g2 / jnp.sqrt(v2 + eps)
    t2 = be2 - m2 * s2
    return {"W1": W1, "b1": b1, "s1": s1, "t1": t1, "prelu": prelu,
            "W2": W2, "b2": b2, "s2": s2, "t2": t2}


if __name__ == "__main__":
    N, Cin, Cout, T, V, K, kt = 2, 4, 4, 16, 16, 3, 3
    key = jax.random.PRNGKey(0)
    kx, ka, kp = jax.random.split(key, 3)
    x = jax.random.normal(kx, (N, Cin, T, V), jnp.float32)
    A = jax.random.uniform(ka, (K, V, V), jnp.float32) / V
    params = make_params(kp, Cin, Cout, K, kt)

    out, A_out = st_gcn_forward(x, A, params)
    out = jax.block_until_ready(out)

    ref = ref_forward(
        np.asarray(x), np.asarray(A),
        np.asarray(params["W1"], np.float64), np.asarray(params["b1"], np.float64),
        np.asarray(params["s1"], np.float64), np.asarray(params["t1"], np.float64),
        float(params["prelu"][0]),
        np.asarray(params["W2"], np.float64), np.asarray(params["b2"], np.float64),
        np.asarray(params["s2"], np.float64), np.asarray(params["t2"], np.float64),
    )
    np.testing.assert_allclose(np.asarray(out), ref, rtol=1e-3, atol=1e-3)
    assert A_out.shape == A.shape
    print("KERNEL_OK")
</pallas_src>

<mosaic_0001>
module attributes {stable_mosaic.version = 11 : i64} {
  func.func @kernel(%arg0: i32, %arg1: memref<8x256xf32, #tpu.memory_space<vmem>>, %arg2: memref<3x256x256xf32, #tpu.memory_space<vmem>>, %arg3: memref<24x8xf32, #tpu.memory_space<vmem>>, %arg4: memref<8x256xf32, #tpu.memory_space<vmem>>, %arg5: memref<1xf32, #tpu.memory_space<smem>>, %arg6: memref<8x24xf32, #tpu.memory_space<vmem>>, %arg7: memref<8x1xf32, #tpu.memory_space<vmem>>, %arg8: memref<8x256xf32, #tpu.memory_space<vmem>>) attributes {dimension_semantics = [#tpu.dimension_semantics<parallel>], iteration_bounds = array<i64: 1>, scalar_prefetch = 0 : i64, scratch_operands = 0 : i64, tpu.core_type = #tpu.core_type<tc>, window_params = [{transform_indices = @transform_0, window_bounds = array<i64: 8, 256>}, {pipeline_mode = #tpu.pipeline_mode<synchronous>, transform_indices = @transform_1, window_bounds = array<i64: 3, 256, 256>}, {pipeline_mode = #tpu.pipeline_mode<synchronous>, transform_indices = @transform_2, window_bounds = array<i64: 24, 8>}, {pipeline_mode = #tpu.pipeline_mode<synchronous>, transform_indices = @transform_3, window_bounds = array<i64: 8, 256>}, {transform_indices = @transform_4, window_bounds = array<i64: 1>}, {pipeline_mode = #tpu.pipeline_mode<synchronous>, transform_indices = @transform_5, window_bounds = array<i64: 8, 24>}, {pipeline_mode = #tpu.pipeline_mode<synchronous>, transform_indices = @transform_6, window_bounds = array<i64: 8, 1>}, {transform_indices = @transform_7, window_bounds = array<i64: 8, 256>}]} {
    %c0 = arith.constant 0 : index
    %c0_0 = arith.constant 0 : index
    %0 = vector.load %arg1[%c0, %c0_0] : memref<8x256xf32, #tpu.memory_space<vmem>>, vector<8x256xf32>
    %c0_1 = arith.constant 0 : index
    %c0_2 = arith.constant 0 : index
    %1 = vector.load %arg3[%c0_1, %c0_2] : memref<24x8xf32, #tpu.memory_space<vmem>>, vector<24x8xf32>
    %cst = arith.constant dense<0.000000e+00> : vector<24x256xf32>
    %2 = tpu.matmul %1, %0, %cst {dimension_numbers = #tpu.dot_dimension_numbers<[1], [0], [0], [1], [0, 0, 1, 1], [], []>} : vector<24x8xf32>, vector<8x256xf32>, vector<24x256xf32> -> vector<24x256xf32>
    %c0_3 = arith.constant 0 : index
    %c0_4 = arith.constant 0 : index
    %3 = vector.load %arg4[%c0_3, %c0_4] : memref<8x256xf32, #tpu.memory_space<vmem>>, vector<8x256xf32>
    %4 = vector.extract_strided_slice %2 {offsets = [0, 0], sizes = [8, 256], strides = [1, 1]} : vector<24x256xf32> to vector<8x256xf32>
    %c0_5 = arith.constant 0 : index
    %c0_6 = arith.constant 0 : index
    %c0_7 = arith.constant 0 : index
    %5 = vector.load %arg2[%c0_5, %c0_6, %c0_7] : memref<3x256x256xf32, #tpu.memory_space<vmem>>, vector<1x256x256xf32>
    %6 = vector.shape_cast %5 : vector<1x256x256xf32> to vector<256x256xf32>
    %cst_8 = arith.constant dense<0.000000e+00> : vector<8x256xf32>
    %7 = tpu.matmul %4, %6, %cst_8 {dimension_numbers = #tpu.dot_dimension_numbers<[1], [0], [0], [1], [0, 0, 1, 1], [], []>} : vector<8x256xf32>, vector<256x256xf32>, vector<8x256xf32> -> vector<8x256xf32>
    %8 = arith.addf %3, %7 : vector<8x256xf32>
    %9 = vector.extract_strided_slice %2 {offsets = [8, 0], sizes = [8, 256], strides = [1, 1]} : vector<24x256xf32> to vector<8x256xf32>
    %c1 = arith.constant 1 : index
    %c0_9 = arith.constant 0 : index
    %c0_10 = arith.constant 0 : index
    %10 = vector.load %arg2[%c1, %c0_9, %c0_10] : memref<3x256x256xf32, #tpu.memory_space<vmem>>, vector<1x256x256xf32>
    %11 = vector.shape_cast %10 : vector<1x256x256xf32> to vector<256x256xf32>
    %cst_11 = arith.constant dense<0.000000e+00> : vector<8x256xf32>
    %12 = tpu.matmul %9, %11, %cst_11 {dimension_numbers = #tpu.dot_dimension_numbers<[1], [0], [0], [1], [0, 0, 1, 1], [], []>} : vector<8x256xf32>, vector<256x256xf32>, vector<8x256xf32> -> vector<8x256xf32>
    %13 = arith.addf %8, %12 : vector<8x256xf32>
    %14 = vector.extract_strided_slice %2 {offsets = [16, 0], sizes = [8, 256], strides = [1, 1]} : vector<24x256xf32> to vector<8x256xf32>
    %c2 = arith.constant 2 : index
    %c0_12 = arith.constant 0 : index
    %c0_13 = arith.constant 0 : index
    %15 = vector.load %arg2[%c2, %c0_12, %c0_13] : memref<3x256x256xf32, #tpu.memory_space<vmem>>, vector<1x256x256xf32>
    %16 = vector.shape_cast %15 : vector<1x256x256xf32> to vector<256x256xf32>
    %cst_14 = arith.constant dense<0.000000e+00> : vector<8x256xf32>
    %17 = tpu.matmul %14, %16, %cst_14 {dimension_numbers = #tpu.dot_dimension_numbers<[1], [0], [0], [1], [0, 0, 1, 1], [], []>} : vector<8x256xf32>, vector<256x256xf32>, vector<8x256xf32> -> vector<8x256xf32>
    %18 = arith.addf %13, %17 : vector<8x256xf32>
    %c0_15 = arith.constant 0 : index
    %19 = memref.load %arg5[%c0_15] : memref<1xf32, #tpu.memory_space<smem>>
    %cst_16 = arith.constant 0.000000e+00 : f32
    %20 = vector.broadcast %cst_16 : f32 to vector<8x256xf32>
    %21 = arith.cmpf oge, %18, %20 : vector<8x256xf32>
    %22 = vector.broadcast %19 : f32 to vector<8x256xf32>
    %23 = arith.mulf %22, %18 : vector<8x256xf32>
    %24 = arith.select %21, %18, %23 : vector<8x256xi1>, vector<8x256xf32>
    %cst_17 = arith.constant 0.000000e+00 : f32
    %25 = vector.broadcast %cst_17 : f32 to vector<8x16xf32>
    %26 = vector.extract_strided_slice %24 {offsets = [0, 0], sizes = [8, 240], strides = [1, 1]} : vector<8x256xf32> to vector<8x240xf32>
    %27 = tpu.concatenate %25, %26 in 1 : vector<8x16xf32>, vector<8x240xf32> -> vector<8x256xf32>
    %cst_18 = arith.constant 0.000000e+00 : f32
    %28 = vector.broadcast %cst_18 : f32 to vector<8x16xf32>
    %29 = vector.extract_strided_slice %24 {offsets = [0, 16], sizes = [8, 240], strides = [1, 1]} : vector<8x256xf32> to vector<8x240xf32>
    %30 = tpu.concatenate %29, %28 in 1 : vector<8x240xf32>, vector<8x16xf32> -> vector<8x256xf32>
    %31 = tpu.concatenate %27, %24, %30 in 0 : vector<8x256xf32>, vector<8x256xf32>, vector<8x256xf32> -> vector<24x256xf32>
    %c0_19 = arith.constant 0 : index
    %c0_20 = arith.constant 0 : index
    %32 = vector.load %arg6[%c0_19, %c0_20] : memref<8x24xf32, #tpu.memory_space<vmem>>, vector<8x24xf32>
    %cst_21 = arith.constant dense<0.000000e+00> : vector<8x256xf32>
    %33 = tpu.matmul %32, %31, %cst_21 {dimension_numbers = #tpu.dot_dimension_numbers<[1], [0], [0], [1], [0, 0, 1, 1], [], []>} : vector<8x24xf32>, vector<24x256xf32>, vector<8x256xf32> -> vector<8x256xf32>
    %c0_22 = arith.constant 0 : index
    %c0_23 = arith.constant 0 : index
    %34 = vector.load %arg7[%c0_22, %c0_23] : memref<8x1xf32, #tpu.memory_space<vmem>>, vector<8x1xf32>
    %35 = vector.broadcast %34 : vector<8x1xf32> to vector<8x256xf32>
    %36 = arith.addf %33, %35 : vector<8x256xf32>
    %37 = arith.addf %36, %0 : vector<8x256xf32>
    %cst_24 = arith.constant 0.000000e+00 : f32
    %38 = vector.broadcast %cst_24 : f32 to vector<8x256xf32>
    %39 = arith.cmpf oge, %37, %38 : vector<8x256xf32>
    %cst_25 = arith.constant 0.00999999977 : f32
    %40 = vector.broadcast %cst_25 : f32 to vector<8x256xf32>
    %41 = arith.mulf %40, %37 : vector<8x256xf32>
    %42 = arith.select %39, %37, %41 : vector<8x256xi1>, vector<8x256xf32>
    %c0_26 = arith.constant 0 : index
    %c0_27 = arith.constant 0 : index
    %43 = vector.load %arg8[%c0_26, %c0_27] : memref<8x256xf32, #tpu.memory_space<vmem>>, vector<8x256xf32>
    tpu.vector_store %arg8[%c0_26, %c0_27], %42 {strides = array<i32>} : memref<8x256xf32, #tpu.memory_space<vmem>>, vector<8x256xf32>,
    return
  }
  func.func @transform_0(%arg0: i32) -> (i32, i32) {
    %c0_i32 = arith.constant 0 : i32
    %c0_i32_0 = arith.constant 0 : i32
    return %arg0, %c0_i32 : i32, i32
  }
  func.func @transform_1(%arg0: i32) -> (i32, i32, i32) {
    %c0_i32 = arith.constant 0 : i32
    %c0_i32_0 = arith.constant 0 : i32
    %c0_i32_1 = arith.constant 0 : i32
    %c0_i32_2 = arith.constant 0 : i32
    return %c0_i32, %c0_i32_0, %c0_i32_1 : i32, i32, i32
  }
  func.func @transform_2(%arg0: i32) -> (i32, i32) {
    %c0_i32 = arith.constant 0 : i32
    %c0_i32_0 = arith.constant 0 : i32
    %c0_i32_1 = arith.constant 0 : i32
    return %c0_i32, %c0_i32_0 : i32, i32
  }
  func.func @transform_3(%arg0: i32) -> (i32, i32) {
    %c0_i32 = arith.constant 0 : i32
    %c0_i32_0 = arith.constant 0 : i32
    %c0_i32_1 = arith.constant 0 : i32
    return %c0_i32, %c0_i32_0 : i32, i32
  }
  func.func @transform_4(%arg0: i32) -> i32 {
    %c0_i32 = arith.constant 0 : i32
    %c0_i32_0 = arith.constant 0 : i32
    return %c0_i32 : i32
  }
  func.func @transform_5(%arg0: i32) -> (i32, i32) {
    %c0_i32 = arith.constant 0 : i32
    %c0_i32_0 = arith.constant 0 : i32
    %c0_i32_1 = arith.constant 0 : i32
    return %c0_i32, %c0_i32_0 : i32, i32
  }
  func.func @transform_6(%arg0: i32) -> (i32, i32) {
    %c0_i32 = arith.constant 0 : i32
    %c0_i32_0 = arith.constant 0 : i32
    %c0_i32_1 = arith.constant 0 : i32
    return %c0_i32, %c0_i32_0 : i32, i32
  }
  func.func @transform_7(%arg0: i32) -> (i32, i32) {
    %c0_i32 = arith.constant 0 : i32
    %c0_i32_0 = arith.constant 0 : i32
    return %arg0, %c0_i32 : i32, i32
  }
}

</mosaic_0001>

<bundles_post_ra>
// kernel: tpu_custom_call.1
= control target key start
LH: loop header
LB: loop body
LE: loop exit
PB: predicated region body
PF: predicated region fallthrough
CT: control target
= control target key end

     0   :  { %13 = vsyncpa [#allocation4], 0  ;;  %s853_s0 = inlined_call_operand.vmem [shape: f32[8,256], index: 0, kind: input, shape index: {}]   ;;  %s854_s1 = inlined_call_operand.hbm [shape: f32[3,256,256], index: 1, kind: input, shape index: {}]   ;;  %s855_s2 = inlined_call_operand.vmem [shape: f32[24,8], index: 2, kind: input, shape index: {}]   ;;  %s856_s3 = inlined_call_operand.vmem [shape: f32[8,256], index: 3, kind: input, shape index: {}]   ;;  %s857_s4 = inlined_call_operand.<no memory space> [shape: f32[1], index: 4, kind: input, shape index: {}]   ;;  %s858_s5 = inlined_call_operand.vmem [shape: f32[8,24], index: 5, kind: input, shape index: {}]   ;;  %s859_s6 = inlined_call_operand.vmem [shape: f32[8,1], index: 6, kind: input, shape index: {}]   ;;  %s860_s7 = inlined_call_operand.hbm [shape: f32[8,256], index: 7, kind: output, shape index: {}]  }
   0x1   :  { %14 = vsyncpa [#allocation5], 0  ;;  %s749_s24 = smov [#allocation3]  }
   0x2   :  { %s22_s25 = sshll.u32 %s749_s24, 4  ;;  %s23_s25 = int_to_ptr.vmem [resolvable:$true] %s22_s25 }
   0x3   :  { %s713_s26 = scalar_lea.vmem %s23_s25, 24576  ;;  %p718_p1 = scmp.lt.s32.totalorder %s23_s25, %s23_s25 }
   0x4   :  { %p714_p0 = scmp.ne.s32.totalorder %s23_s25, %s713_s26  ;;  %p719_p2 = scmp.lt.s32.totalorder %s713_s26, %s713_s26 }
   0x6   :  { %p720_p3 = por %p719_p2, %p718_p1 }
   0x8   :  { %p721_p4 = pnand %p720_p3, %p714_p0 }
   0xa   :  { %724 = shalt.err (!%p721_p4)
}
   0xb   :  { %s750_s27 = smov 256   ;;  %s751_s28 = smov 16  }
   0xc   :  { %28 = dma.hbm_to_vmem [thread:$0]  %s854_s1, 24576, %s23_s25, [#allocation4], %s750_s27, %s750_s27, %s751_s28  }
   0xd   :  { %745 = dma.done.wait [#allocation4], 24576  }
   0xe   :  { %746 = vsyncadd [#allocation4], 4294942720  ;;  %v752_v0 = vmov 0.0   ;;  %v804_v1 = vld [vmem:[%s853_s0 + $0x8] sm:$0xff]  ;;  %v809_v2 = vld [vmem:[%s853_s0] sm:$0xff]  ;;  %vm47_vm0 = vcmask 64512  }
   0xf   :  { %121 = vmatprep.mubr.f32.mxu0 %v752_v0  ;;  %v44_v3 = vld [vmem:[%s855_s2] sm:$0xff]  ;;  %87 = vmatprep.subr.mxu0 %v804_v1  ;;  %v173_v4 = vld [vmem:[#allocation3 + $0xf8] sm:$0xff]  ;;  %v172_v5 = vld [vmem:[#allocation3 + $0xf0] sm:$0xff]  ;;  %vm578_vm3 = vcmask 916480   ;;  %vm569_vm4 = vcmask 130048   ;;  %vm590_vm6 = vcmask 195584  }
  0x10   :  { %88 = vmatpush1.msra.mxu0 %v809_v2  ;;  %206 = vmatprep.subr.mxu1 %v173_v4  ;;  %v171_v6 = vld [vmem:[#allocation3 + $0xe8] sm:$0xff]  ;;  %v170_v7 = vld [vmem:[#allocation3 + $0xe0] sm:$0xff]  ;;  %v169_v8 = vld [vmem:[#allocation3 + $0xd8] sm:$0xff] }
  0x11   :  { %690 = vmatmul.mubr.msk.f32.vlgmr.msra.gmra.mxu0 %vm47_vm0, %v44_v3  ;;  %207 = vmatpush1.msra.mxu1 %v172_v5  ;;  %v311_v9 = vld [vmem:[#allocation3 + $0x2f8] sm:$0xff]  ;;  %v45_v10 = vld [vmem:[%s855_s2 + $0x8] sm:$0xff]  ;;  %v168_v11 = vld [vmem:[#allocation3 + $0xd0] sm:$0xff] }
  0x12   :  { %127 = vmatprep.mubr.f32.mxu0 %v752_v0  ;;  %208 = vmatprep.subr.mxu1 %v171_v6  ;;  %v310_v12 = vld [vmem:[#allocation3 + $0x2f0] sm:$0xff]  ;;  %v167_v13 = vld [vmem:[#allocation3 + $0xc8] sm:$0xff]  ;;  %v166_v14 = vld [vmem:[#allocation3 + $0xc0] sm:$0xff] }
  0x13   :  { %209 = vmatpush1.msra.mxu1 %v170_v7  ;;  %344 = vmatprep.subr.mxu0 %v311_v9  ;;  %v309_v15 = vld [vmem:[#allocation3 + $0x2e8] sm:$0xff]  ;;  %v165_v16 = vld [vmem:[#allocation3 + $0xb8] sm:$0xff]  ;;  %v308_v17 = vld [vmem:[#allocation3 + $0x2e0] sm:$0xff] }
  0x14   :  { %210 = vmatprep.subr.mxu1 %v169_v8  ;;  %345 = vmatpush1.msra.mxu0 %v310_v12  ;;  %v46_v18 = vld [vmem:[%s855_s2 + $0x10] sm:$0xff]  ;;  %v307_v20 = vld [vmem:[#allocation3 + $0x2d8] sm:$0xff]  ;;  %v163_v21 = vld [vmem:[#allocation3 + $0xa8] sm:$0xff] }
  0x15   :  { %691 = vmatmul.mubr.msk.f32.gmra.mxu0 %vm47_vm0, %v45_v10  ;;  %211 = vmatpush1.msra.mxu1 %v168_v11  ;;  %v164_v19 = vld [vmem:[#allocation3 + $0xb0] sm:$0xff]  ;;  %v162_v23 = vld [vmem:[#allocation3 + $0xa0] sm:$0xff]  ;;  %v305_v24 = vld [vmem:[#allocation3 + $0x2c8] sm:$0xff] }
  0x16   :  { %133 = vmatprep.mubr.f32.mxu0 %v752_v0  ;;  %212 = vmatprep.subr.mxu1 %v167_v13  ;;  %v306_v22 = vld [vmem:[#allocation3 + $0x2d0] sm:$0xff]  ;;  %v161_v25 = vld [vmem:[#allocation3 + $0x98] sm:$0xff]  ;;  %v304_v26 = vld [vmem:[#allocation3 + $0x2c0] sm:$0xff] }
  0x17   :  { %213 = vmatpush1.msra.mxu1 %v166_v14  ;;  %346 = vmatprep.subr.mxu0 %v309_v15  ;;  %v160_v27 = vld [vmem:[#allocation3 + $0x90] sm:$0xff]  ;;  %v303_v28 = vld [vmem:[#allocation3 + $0x2b8] sm:$0xff]  ;;  %v159_v29 = vld [vmem:[#allocation3 + $0x88] sm:$0xff] }
  0x18   :  { %214 = vmatprep.subr.mxu1 %v165_v16  ;;  %347 = vmatpush1.msra.mxu0 %v308_v17  ;;  %v302_v30 = vld [vmem:[#allocation3 + $0x2b0] sm:$0xff]  ;;  %v158_v31 = vld [vmem:[#allocation3 + $0x80] sm:$0xff]  ;;  %v301_v32 = vld [vmem:[#allocation3 + $0x2a8] sm:$0xff] }
  0x19   :  { %692 = vmatmul.mubr.msk.f32.gmra.mxu0 %vm47_vm0, %v46_v18  ;;  %215 = vmatpush1.msra.mxu1 %v164_v19  ;;  %v157_v33 = vld [vmem:[#allocation3 + $0x78] sm:$0xff]  ;;  %v300_v34 = vld [vmem:[#allocation3 + $0x2a0] sm:$0xff]  ;;  %v156_v35 = vld [vmem:[#allocation3 + $0x70] sm:$0xff] }
  0x1a   :  { %348 = vmatprep.subr.mxu0 %v307_v20  ;;  %216 = vmatprep.subr.mxu1 %v163_v21  ;;  %v299_v36 = vld [vmem:[#allocation3 + $0x298] sm:$0xff]  ;;  %v155_v37 = vld [vmem:[#allocation3 + $0x68] sm:$0xff]  ;;  %v298_v38 = vld [vmem:[#allocation3 + $0x290] sm:$0xff] }
  0x1b   :  { %349 = vmatpush1.msra.mxu0 %v306_v22  ;;  %217 = vmatpush1.msra.mxu1 %v162_v23  ;;  %v154_v39 = vld [vmem:[#allocation3 + $0x60] sm:$0xff]  ;;  %v297_v40 = vld [vmem:[#allocation3 + $0x288] sm:$0xff]  ;;  %v153_v41 = vld [vmem:[#allocation3 + $0x58] sm:$0xff] }
  0x1c   :  { %350 = vmatprep.subr.mxu0 %v305_v24  ;;  %218 = vmatprep.subr.mxu1 %v161_v25  ;;  %v296_v42 = vld [vmem:[#allocation3 + $0x280] sm:$0xff]  ;;  %v152_v43 = vld [vmem:[#allocation3 + $0x50] sm:$0xff]  ;;  %v295_v44 = vld [vmem:[#allocation3 + $0x278] sm:$0xff] }
  0x1d   :  { %351 = vmatpush1.msra.mxu0 %v304_v26  ;;  %219 = vmatpush1.msra.mxu1 %v160_v27  ;;  %v151_v45 = vld [vmem:[#allocation3 + $0x48] sm:$0xff]  ;;  %v294_v46 = vld [vmem:[#allocation3 + $0x270] sm:$0xff]  ;;  %v150_v47 = vld [vmem:[#allocation3 + $0x40] sm:$0xff] }
  0x1e   :  { %352 = vmatprep.subr.mxu0 %v303_v28  ;;  %220 = vmatprep.subr.mxu1 %v159_v29  ;;  %v293_v48 = vld [vmem:[#allocation3 + $0x268] sm:$0xff]  ;;  %v149_v49 = vld [vmem:[#allocation3 + $0x38] sm:$0xff]  ;;  %v292_v50 = vld [vmem:[#allocation3 + $0x260] sm:$0xff] }
  0x1f   :  { %353 = vmatpush1.msra.mxu0 %v302_v30  ;;  %221 = vmatpush1.msra.mxu1 %v158_v31  ;;  %v148_v51 = vld [vmem:[#allocation3 + $0x30] sm:$0xff]  ;;  %v291_v52 = vld [vmem:[#allocation3 + $0x258] sm:$0xff]  ;;  %v147_v53 = vld [vmem:[#allocation3 + $0x28] sm:$0xff] }
  0x20   :  { %354 = vmatprep.subr.mxu0 %v301_v32  ;;  %222 = vmatprep.subr.mxu1 %v157_v33  ;;  %v290_v54 = vld [vmem:[#allocation3 + $0x250] sm:$0xff]  ;;  %v146_v55 = vld [vmem:[#allocation3 + $0x20] sm:$0xff]  ;;  %v289_v56 = vld [vmem:[#allocation3 + $0x248] sm:$0xff] }
  0x21   :  { %355 = vmatpush1.msra.mxu0 %v300_v34  ;;  %223 = vmatpush1.msra.mxu1 %v156_v35  ;;  %v145_v57 = vld [vmem:[#allocation3 + $0x18] sm:$0xff]  ;;  %v288_v58 = vld [vmem:[#allocation3 + $0x240] sm:$0xff]  ;;  %v144_v59 = vld [vmem:[#allocation3 + $0x10] sm:$0xff] }
  0x22   :  { %356 = vmatprep.subr.mxu0 %v299_v36  ;;  %224 = vmatprep.subr.mxu1 %v155_v37  ;;  %v287_v60 = vld [vmem:[#allocation3 + $0x238] sm:$0xff]  ;;  %v143_v61 = vld [vmem:[#allocation3 + $0x8] sm:$0xff]  ;;  %v286_v62 = vld [vmem:[#allocation3 + $0x230] sm:$0xff] }
  0x23   :  { %357 = vmatpush1.msra.mxu0 %v298_v38  ;;  %225 = vmatpush1.msra.mxu1 %v154_v39  ;;  %v142_v63 = vld [vmem:[#allocation3] sm:$0xff]  ;;  %v285_v3 = vld [vmem:[#allocation3 + $0x228] sm:$0xff]  ;;  %v205_v4 = vld [vmem:[#allocation3 + $0x1f8] sm:$0xff] }
  0x24   :  { %358 = vmatprep.subr.mxu0 %v297_v40  ;;  %226 = vmatprep.subr.mxu1 %v153_v41  ;;  %v284_v5 = vld [vmem:[#allocation3 + $0x220] sm:$0xff]  ;;  %v204_v6 = vld [vmem:[#allocation3 + $0x1f0] sm:$0xff]  ;;  %v283_v7 = vld [vmem:[#allocation3 + $0x218] sm:$0xff] }
  0x25   :  { %359 = vmatpush1.msra.mxu0 %v296_v42  ;;  %227 = vmatpush1.msra.mxu1 %v152_v43  ;;  %v203_v8 = vld [vmem:[#allocation3 + $0x1e8] sm:$0xff]  ;;  %v282_v9 = vld [vmem:[#allocation3 + $0x210] sm:$0xff]  ;;  %v202_v10 = vld [vmem:[#allocation3 + $0x1e0] sm:$0xff] }
  0x26   :  { %360 = vmatprep.subr.mxu0 %v295_v44  ;;  %228 = vmatprep.subr.mxu1 %v151_v45  ;;  %v281_v11 = vld [vmem:[#allocation3 + $0x208] sm:$0xff]  ;;  %v201_v12 = vld [vmem:[#allocation3 + $0x1d8] sm:$0xff]  ;;  %v280_v13 = vld [vmem:[#allocation3 + $0x200] sm:$0xff] }
  0x27   :  { %361 = vmatpush1.msra.mxu0 %v294_v46  ;;  %229 = vmatpush1.msra.mxu1 %v150_v47  ;;  %v200_v14 = vld [vmem:[#allocation3 + $0x1d0] sm:$0xff]  ;;  %v343_v15 = vld [vmem:[#allocation3 + $0x3f8] sm:$0xff]  ;;  %v199_v16 = vld [vmem:[#allocation3 + $0x1c8] sm:$0xff] }
  0x28   :  { %362 = vmatprep.subr.mxu0 %v293_v48  ;;  %230 = vmatprep.subr.mxu1 %v149_v49  ;;  %v342_v17 = vld [vmem:[#allocation3 + $0x3f0] sm:$0xff]  ;;  %v198_v18 = vld [vmem:[#allocation3 + $0x1c0] sm:$0xff]  ;;  %v341_v19 = vld [vmem:[#allocation3 + $0x3e8] sm:$0xff] }
  0x29   :  { %363 = vmatpush1.msra.mxu0 %v292_v50  ;;  %231 = vmatpush1.msra.mxu1 %v148_v51  ;;  %v197_v20 = vld [vmem:[#allocation3 + $0x1b8] sm:$0xff]  ;;  %v340_v21 = vld [vmem:[#allocation3 + $0x3e0] sm:$0xff]  ;;  %v196_v22 = vld [vmem:[#allocation3 + $0x1b0] sm:$0xff] }
  0x2a   :  { %364 = vmatprep.subr.mxu0 %v291_v52  ;;  %232 = vmatprep.subr.mxu1 %v147_v53  ;;  %v339_v23 = vld [vmem:[#allocation3 + $0x3d8] sm:$0xff]  ;;  %v195_v24 = vld [vmem:[#allocation3 + $0x1a8] sm:$0xff]  ;;  %v338_v25 = vld [vmem:[#allocation3 + $0x3d0] sm:$0xff] }
  0x2b   :  { %365 = vmatpush1.msra.mxu0 %v290_v54  ;;  %233 = vmatpush1.msra.mxu1 %v146_v55  ;;  %v194_v26 = vld [vmem:[#allocation3 + $0x1a0] sm:$0xff]  ;;  %v337_v27 = vld [vmem:[#allocation3 + $0x3c8] sm:$0xff]  ;;  %v193_v28 = vld [vmem:[#allocation3 + $0x198] sm:$0xff] }
  0x2c   :  { %366 = vmatprep.subr.mxu0 %v289_v56  ;;  %234 = vmatprep.subr.mxu1 %v145_v57  ;;  %v336_v29 = vld [vmem:[#allocation3 + $0x3c0] sm:$0xff]  ;;  %v192_v30 = vld [vmem:[#allocation3 + $0x190] sm:$0xff]  ;;  %v335_v31 = vld [vmem:[#allocation3 + $0x3b8] sm:$0xff] }
  0x2d   :  { %367 = vmatpush1.msra.mxu0 %v288_v58  ;;  %235 = vmatpush1.msra.mxu1 %v144_v59  ;;  %v191_v32 = vld [vmem:[#allocation3 + $0x188] sm:$0xff]  ;;  %v334_v33 = vld [vmem:[#allocation3 + $0x3b0] sm:$0xff]  ;;  %v190_v34 = vld [vmem:[#allocation3 + $0x180] sm:$0xff] }
  0x2e   :  { %368 = vmatprep.subr.mxu0 %v287_v60  ;;  %236 = vmatprep.subr.mxu1 %v143_v61  ;;  %v333_v35 = vld [vmem:[#allocation3 + $0x3a8] sm:$0xff]  ;;  %v189_v36 = vld [vmem:[#allocation3 + $0x178] sm:$0xff]  ;;  %v332_v37 = vld [vmem:[#allocation3 + $0x3a0] sm:$0xff] }
  0x2f   :  { %369 = vmatpush1.msra.mxu0 %v286_v62  ;;  %237 = vmatpush1.msra.mxu1 %v142_v63  ;;  %v188_v38 = vld [vmem:[#allocation3 + $0x170] sm:$0xff]  ;;  %v331_v39 = vld [vmem:[#allocation3 + $0x398] sm:$0xff]  ;;  %v187_v40 = vld [vmem:[#allocation3 + $0x168] sm:$0xff] }
  0x30   :  { %370 = vmatprep.subr.mxu0 %v285_v3  ;;  %238 = vmatprep.subr.mxu1 %v205_v4  ;;  %v330_v41 = vld [vmem:[#allocation3 + $0x390] sm:$0xff]  ;;  %v186_v42 = vld [vmem:[#allocation3 + $0x160] sm:$0xff]  ;;  %v329_v43 = vld [vmem:[#allocation3 + $0x388] sm:$0xff] }
  0x31   :  { %371 = vmatpush1.msra.mxu0 %v284_v5  ;;  %239 = vmatpush2.msra.mxu1 %v204_v6  ;;  %v185_v44 = vld [vmem:[#allocation3 + $0x158] sm:$0xff]  ;;  %v328_v45 = vld [vmem:[#allocation3 + $0x380] sm:$0xff]  ;;  %v184_v46 = vld [vmem:[#allocation3 + $0x150] sm:$0xff] }
  0x32   :  { %372 = vmatprep.subr.mxu0 %v283_v7  ;;  %240 = vmatprep.subr.mxu1 %v203_v8  ;;  %v327_v47 = vld [vmem:[#allocation3 + $0x378] sm:$0xff]  ;;  %v183_v48 = vld [vmem:[#allocation3 + $0x148] sm:$0xff]  ;;  %v326_v49 = vld [vmem:[#allocation3 + $0x370] sm:$0xff] }
  0x33   :  { %373 = vmatpush1.msra.mxu0 %v282_v9  ;;  %241 = vmatpush2.msra.mxu1 %v202_v10  ;;  %v182_v50 = vld [vmem:[#allocation3 + $0x140] sm:$0xff]  ;;  %v325_v51 = vld [vmem:[#allocation3 + $0x368] sm:$0xff]  ;;  %v181_v52 = vld [vmem:[#allocation3 + $0x138] sm:$0xff] }
  0x34   :  { %374 = vmatprep.subr.mxu0 %v281_v11  ;;  %242 = vmatprep.subr.mxu1 %v201_v12  ;;  %v324_v53 = vld [vmem:[#allocation3 + $0x360] sm:$0xff]  ;;  %v180_v54 = vld [vmem:[#allocation3 + $0x130] sm:$0xff]  ;;  %v323_v55 = vld [vmem:[#allocation3 + $0x358] sm:$0xff] }
  0x35   :  { %375 = vmatpush1.msra.mxu0 %v280_v13  ;;  %243 = vmatpush2.msra.mxu1 %v200_v14  ;;  %v179_v56 = vld [vmem:[#allocation3 + $0x128] sm:$0xff]  ;;  %v322_v57 = vld [vmem:[#allocation3 + $0x350] sm:$0xff]  ;;  %v178_v58 = vld [vmem:[#allocation3 + $0x120] sm:$0xff] }
  0x36   :  { %376 = vmatprep.subr.mxu0 %v343_v15  ;;  %244 = vmatprep.subr.mxu1 %v199_v16  ;;  %v321_v59 = vld [vmem:[#allocation3 + $0x348] sm:$0xff]  ;;  %v177_v60 = vld [vmem:[#allocation3 + $0x118] sm:$0xff]  ;;  %v320_v61 = vld [vmem:[#allocation3 + $0x340] sm:$0xff] }
  0x37   :  { %377 = vmatpush2.msra.mxu0 %v342_v17  ;;  %245 = vmatpush2.msra.mxu1 %v198_v18  ;;  %v176_v62 = vld [vmem:[#allocation3 + $0x110] sm:$0xff]  ;;  %v319_v63 = vld [vmem:[#allocation3 + $0x338] sm:$0xff]  ;;  %v175_v3 = vld [vmem:[#allocation3 + $0x108] sm:$0xff] }
  0x38   :  { %378 = vmatprep.subr.mxu0 %v341_v19  ;;  %246 = vmatprep.subr.mxu1 %v197_v20  ;;  %v318_v4 = vld [vmem:[#allocation3 + $0x330] sm:$0xff]  ;;  %v174_v5 = vld [vmem:[#allocation3 + $0x100] sm:$0xff]  ;;  %v317_v6 = vld [vmem:[#allocation3 + $0x328] sm:$0xff] }
  0x39   :  { %379 = vmatpush2.msra.mxu0 %v340_v21  ;;  %247 = vmatpush2.msra.mxu1 %v196_v22  ;;  %v316_v7 = vld [vmem:[#allocation3 + $0x320] sm:$0xff]  ;;  %v449_v8 = vld [vmem:[#allocation3 + $0x4f8] sm:$0xff]  ;;  %v314_v10 = vld [vmem:[#allocation3 + $0x310] sm:$0xff] }
  0x3a   :  { %380 = vmatprep.subr.mxu0 %v339_v23  ;;  %248 = vmatprep.subr.mxu1 %v195_v24  ;;  %v315_v9 = vld [vmem:[#allocation3 + $0x318] sm:$0xff]  ;;  %v313_v11 = vld [vmem:[#allocation3 + $0x308] sm:$0xff]  ;;  %v312_v12 = vld [vmem:[#allocation3 + $0x300] sm:$0xff] }
  0x3b   :  { %381 = vmatpush2.msra.mxu0 %v338_v25  ;;  %249 = vmatpush2.msra.mxu1 %v194_v26  ;;  %v448_v15 = vld [vmem:[#allocation3 + $0x4f0] sm:$0xff]  ;;  %v447_v16 = vld [vmem:[#allocation3 + $0x4e8] sm:$0xff]  ;;  %v446_v18 = vld [vmem:[#allocation3 + $0x4e0] sm:$0xff] }
  0x3c   :  { %382 = vmatprep.subr.mxu0 %v337_v27  ;;  %250 = vmatprep.subr.mxu1 %v193_v28  ;;  %v445_v19 = vld [vmem:[#allocation3 + $0x4d8] sm:$0xff]  ;;  %v444_v21 = vld [vmem:[#allocation3 + $0x4d0] sm:$0xff]  ;;  %v443_v22 = vld [vmem:[#allocation3 + $0x4c8] sm:$0xff] }
  0x3d   :  { %383 = vmatpush2.msra.mxu0 %v336_v29  ;;  %251 = vmatpush2.msra.mxu1 %v192_v30  ;;  %v442_v23 = vld [vmem:[#allocation3 + $0x4c0] sm:$0xff]  ;;  %v441_v25 = vld [vmem:[#allocation3 + $0x4b8] sm:$0xff]  ;;  %v440_v26 = vld [vmem:[#allocation3 + $0x4b0] sm:$0xff] }
  0x3e   :  { %384 = vmatprep.subr.mxu0 %v335_v31  ;;  %252 = vmatprep.subr.mxu1 %v191_v32  ;;  %v439_v28 = vld [vmem:[#allocation3 + $0x4a8] sm:$0xff]  ;;  %v438_v29 = vld [vmem:[#allocation3 + $0x4a0] sm:$0xff]  ;;  %v437_v30 = vld [vmem:[#allocation3 + $0x498] sm:$0xff] }
  0x3f   :  { %385 = vmatpush2.msra.mxu0 %v334_v33  ;;  %253 = vmatpush2.msra.mxu1 %v190_v34  ;;  %v436_v31 = vld [vmem:[#allocation3 + $0x490] sm:$0xff]  ;;  %v435_v32 = vld [vmem:[#allocation3 + $0x488] sm:$0xff]  ;;  %v434_v33 = vld [vmem:[#allocation3 + $0x480] sm:$0xff] }
  0x40   :  { %386 = vmatprep.subr.mxu0 %v333_v35  ;;  %254 = vmatprep.subr.mxu1 %v189_v36  ;;  %v433_v34 = vld [vmem:[#allocation3 + $0x478] sm:$0xff]  ;;  %v431_v35 = vld [vmem:[#allocation3 + $0x468] sm:$0xff]  ;;  %v430_v36 = vld [vmem:[#allocation3 + $0x460] sm:$0xff] }
  0x41   :  { %387 = vmatpush2.msra.mxu0 %v332_v37  ;;  %255 = vmatpush2.msra.mxu1 %v188_v38  ;;  %v429_v37 = vld [vmem:[#allocation3 + $0x458] sm:$0xff]  ;;  %v428_v38 = vld [vmem:[#allocation3 + $0x450] sm:$0xff]  ;;  %vm694_vm5 = vmneg %vm569_vm4 }
  0x42   :  { %388 = vmatprep.subr.mxu0 %v331_v39  ;;  %256 = vmatprep.subr.mxu1 %v187_v40  ;;  %v427_v39 = vld [vmem:[#allocation3 + $0x448] sm:$0xff]  ;;  %v426_v40 = vld [vmem:[#allocation3 + $0x440] sm:$0xff] }
  0x43   :  { %389 = vmatpush2.msra.mxu0 %v330_v41  ;;  %257 = vmatpush2.msra.mxu1 %v186_v42  ;;  %v425_v41 = vld [vmem:[#allocation3 + $0x438] sm:$0xff]  ;;  %v424_v42 = vld [vmem:[#allocation3 + $0x430] sm:$0xff] }
  0x44   :  { %390 = vmatprep.subr.mxu0 %v329_v43  ;;  %258 = vmatprep.subr.mxu1 %v185_v44  ;;  %v423_v43 = vld [vmem:[#allocation3 + $0x428] sm:$0xff]  ;;  %v422_v44 = vld [vmem:[#allocation3 + $0x420] sm:$0xff] }
  0x45   :  { %391 = vmatpush2.msra.mxu0 %v328_v45  ;;  %259 = vmatpush2.msra.mxu1 %v184_v46  ;;  %v421_v45 = vld [vmem:[#allocation3 + $0x418] sm:$0xff]  ;;  %v420_v46 = vld [vmem:[#allocation3 + $0x410] sm:$0xff] }
  0x46   :  { %392 = vmatprep.subr.mxu0 %v327_v47  ;;  %260 = vmatprep.subr.mxu1 %v183_v48  ;;  %v419_v47 = vld [vmem:[#allocation3 + $0x408] sm:$0xff]  ;;  %v418_v48 = vld [vmem:[#allocation3 + $0x400] sm:$0xff] }
  0x47   :  { %393 = vmatpush2.msra.mxu0 %v326_v49  ;;  %261 = vmatpush2.msra.mxu1 %v182_v50  ;;  %v481_v49 = vld [vmem:[#allocation3 + $0x5f8] sm:$0xff]  ;;  %v480_v50 = vld [vmem:[#allocation3 + $0x5f0] sm:$0xff] }
  0x48   :  { %394 = vmatprep.subr.mxu0 %v325_v51  ;;  %262 = vmatprep.subr.mxu1 %v181_v52  ;;  %v479_v51 = vld [vmem:[#allocation3 + $0x5e8] sm:$0xff]  ;;  %v478_v52 = vld [vmem:[#allocation3 + $0x5e0] sm:$0xff] }
  0x49   :  { %395 = vmatpush2.msra.mxu0 %v324_v53  ;;  %263 = vmatpush2.msra.mxu1 %v180_v54  ;;  %v477_v53 = vld [vmem:[#allocation3 + $0x5d8] sm:$0xff]  ;;  %v476_v54 = vld [vmem:[#allocation3 + $0x5d0] sm:$0xff] }
  0x4a   :  { %396 = vmatprep.subr.mxu0 %v323_v55  ;;  %264 = vmatprep.subr.mxu1 %v179_v56  ;;  %v475_v55 = vld [vmem:[#allocation3 + $0x5c8] sm:$0xff]  ;;  %v474_v56 = vld [vmem:[#allocation3 + $0x5c0] sm:$0xff] }
  0x4b   :  { %397 = vmatpush2.msra.mxu0 %v322_v57  ;;  %265 = vmatpush2.msra.mxu1 %v178_v58  ;;  %v473_v57 = vld [vmem:[#allocation3 + $0x5b8] sm:$0xff]  ;;  %v472_v58 = vld [vmem:[#allocation3 + $0x5b0] sm:$0xff] }
  0x4c   :  { %398 = vmatprep.subr.mxu0 %v321_v59  ;;  %266 = vmatprep.subr.mxu1 %v177_v60  ;;  %v471_v59 = vld [vmem:[#allocation3 + $0x5a8] sm:$0xff]  ;;  %v470_v60 = vld [vmem:[#allocation3 + $0x5a0] sm:$0xff] }
  0x4d   :  { %399 = vmatpush2.msra.mxu0 %v320_v61  ;;  %267 = vmatpush2.msra.mxu1 %v176_v62  ;;  %v469_v61 = vld [vmem:[#allocation3 + $0x598] sm:$0xff]  ;;  %v468_v62 = vld [vmem:[#allocation3 + $0x590] sm:$0xff] }
  0x4e   :  { %400 = vmatprep.subr.mxu0 %v319_v63  ;;  %268 = vmatprep.subr.mxu1 %v175_v3  ;;  %v467_v63 = vld [vmem:[#allocation3 + $0x588] sm:$0xff]  ;;  %v466_v3 = vld [vmem:[#allocation3 + $0x580] sm:$0xff] }
  0x4f   :  { %401 = vmatpush2.msra.mxu0 %v318_v4  ;;  %269 = vmatpush2.msra.mxu1 %v174_v5  ;;  %v465_v4 = vld [vmem:[#allocation3 + $0x578] sm:$0xff]  ;;  %v464_v5 = vld [vmem:[#allocation3 + $0x570] sm:$0xff] }
  0x50   :  { %402 = vmatprep.subr.mxu0 %v317_v6  ;;  %482 = vmatprep.subr.mxu1 %v449_v8  ;;  %v463_v6 = vld [vmem:[#allocation3 + $0x568] sm:$0xff]  ;;  %v461_v8 = vld [vmem:[#allocation3 + $0x558] sm:$0xff] }
  0x51   :  { %403 = vmatpush2.msra.mxu0 %v316_v7  ;;  %v462_v7 = vld [vmem:[#allocation3 + $0x560] sm:$0xff] }
  0x52   :  { %404 = vmatprep.subr.mxu0 %v315_v9  ;;  %v460_v9 = vld [vmem:[#allocation3 + $0x550] sm:$0xff] }
  0x53   :  { %405 = vmatpush2.msra.mxu0 %v314_v10  ;;  %v459_v10 = vld [vmem:[#allocation3 + $0x548] sm:$0xff] }
  0x54   :  { %406 = vmatprep.subr.mxu0 %v313_v11  ;;  %v458_v11 = vld [vmem:[#allocation3 + $0x540] sm:$0xff] }
  0x55   :  { %407 = vmatpush2.msra.mxu0 %v312_v12  ;;  %v457_v12 = vld [vmem:[#allocation3 + $0x538] sm:$0xff] }
  0xd1   :  { %v123_v13 = vpop.f32.mrf.mxu0 }
  0xd3   :  { %v125_v14 = vpop.f32.mrf.mxu0 }
  0xd4   :  { %270 = vmatprep.mubr.f32.mxu1 %v125_v14  ;;  %v455_v14 = vld [vmem:[#allocation3 + $0x528] sm:$0xff] }
  0xd5   :  { %v129_v17 = vpop.f32.mrf.mxu0  ;;  %271 = vmatmul.mubr.f32.vlgmr.msra.gmra.mxu1 %v123_v13  ;;  %v456_v13 = vld [vmem:[#allocation3 + $0x530] sm:$0xff] }
  0xd6   :  { %483 = vmatpush1.msra.mxu1 %v448_v15  ;;  %v454_v15 = vld [vmem:[#allocation3 + $0x520] sm:$0xff] }
  0xd7   :  { %484 = vmatprep.subr.mxu1 %v447_v16  ;;  %v131_v20 = vpop.f32.mrf.mxu0  ;;  %v453_v16 = vld [vmem:[#allocation3 + $0x518] sm:$0xff] }
  0xd8   :  { %485 = vmatpush1.msra.mxu1 %v446_v18  ;;  %408 = vmatprep.mubr.f32.mxu0 %v131_v20  ;;  %v451_v18 = vld [vmem:[#allocation3 + $0x508] sm:$0xff] }
  0xd9   :  { %486 = vmatprep.subr.mxu1 %v445_v19  ;;  %409 = vmatmul.mubr.f32.vlgmr.msra.gmra.mxu0 %v129_v17  ;;  %v827_v24 = vpop.f32.mrf.mxu0  ;;  %v452_v17 = vld [vmem:[#allocation3 + $0x510] sm:$0xff]  ;;  %v450_v19 = vld [vmem:[#allocation3 + $0x500] sm:$0xff] }
  0xda   :  { %487 = vmatpush1.msra.mxu1 %v444_v21  ;;  %658 = vmatprep.mubr.f32.mxu0 %v752_v0  ;;  %v432_v0 = vld [vmem:[#allocation3 + $0x470] sm:$0xff]  ;;  %v140_v21 = vld [vmem:[%s856_s3] sm:$0xff] }
  0xdb   :  { %488 = vmatprep.subr.mxu1 %v443_v22  ;;  %v137_v27 = vpop.f32.mrf.mxu0 }
  0xdc   :  { %489 = vmatpush1.msra.mxu1 %v442_v23  ;;  %546 = vmatprep.mubr.f32.mxu1 %v137_v27  ;;  %v141_v23 = vld [vmem:[%s856_s3 + $0x8] sm:$0xff]  ;;  %s754_s3 = smov 112  }
  0xdd   :  { %490 = vmatprep.subr.mxu1 %v441_v25 }
  0xde   :  { %491 = vmatpush1.msra.mxu1 %v440_v26 }
  0xdf   :  { %492 = vmatprep.subr.mxu1 %v439_v28 }
  0xe0   :  { %493 = vmatpush1.msra.mxu1 %v438_v29 }
  0xe1   :  { %494 = vmatprep.subr.mxu1 %v437_v30 }
  0xe2   :  { %495 = vmatpush1.msra.mxu1 %v436_v31 }
  0xe3   :  { %496 = vmatprep.subr.mxu1 %v435_v32 }
  0xe4   :  { %497 = vmatpush1.msra.mxu1 %v434_v33 }
  0xe5   :  { %498 = vmatprep.subr.mxu1 %v433_v34 }
  0xe6   :  { %499 = vmatpush1.msra.mxu1 %v432_v0 }
  0xe7   :  { %500 = vmatprep.subr.mxu1 %v431_v35  ;;  %v753_v35 = vmov 0  }
  0xe8   :  { %501 = vmatpush1.msra.mxu1 %v430_v36  ;;  %704 = vset.pattern.permute.xlu0 %v753_v35 }
  0xe9   :  { %502 = vmatprep.subr.mxu1 %v429_v37 }
  0xea   :  { %503 = vmatpush1.msra.mxu1 %v428_v38 }
  0xeb   :  { %504 = vmatprep.subr.mxu1 %v427_v39  ;;  %v584_v39 = vld [vmem:[%s859_s6] sm:$0xff]  ;;  %s755_s6 = smov [#allocation6]  }
  0xec   :  { %505 = vmatpush1.msra.mxu1 %v426_v40  ;;  %s681_s24 = sshll.u32 %s755_s6, 4  ;;  %s682_s24 = int_to_ptr.vmem [resolvable:$true] %s681_s24 }
  0xed   :  { %506 = vmatprep.subr.mxu1 %v425_v41  ;;  %p730_p6 = scmp.lt.s32.totalorder %s682_s24, %s682_s24 }
  0xee   :  { %507 = vmatpush1.msra.mxu1 %v424_v42 }
  0xef   :  { %508 = vmatprep.subr.mxu1 %v423_v43 }
  0xf0   :  { %509 = vmatpush1.msra.mxu1 %v422_v44 }
  0xf1   :  { %510 = vmatprep.subr.mxu1 %v421_v45 }
  0xf2   :  { %511 = vmatpush1.msra.mxu1 %v420_v46  ;;  %v583_v46 = vld [vmem:[%s858_s5] sm:$0xff]  ;;  %s725_s5 = scalar_lea.vmem %s682_s24, 256 }
  0xf3   :  { %512 = vmatprep.subr.mxu1 %v419_v47  ;;  %p726_p5 = scmp.ne.s32.totalorder %s682_s24, %s725_s5  ;;  %p731_p7 = scmp.lt.s32.totalorder %s725_s5, %s725_s5 }
  0xf4   :  { %513 = vmatpush1.msra.mxu1 %v418_v48 }
  0xf5   :  { %514 = vmatprep.subr.mxu1 %v481_v49  ;;  %p732_p8 = por %p731_p7, %p730_p6 }
  0xf6   :  { %515 = vmatpush2.msra.mxu1 %v480_v50 }
  0xf7   :  { %516 = vmatprep.subr.mxu1 %v479_v51  ;;  %p733_p9 = pnand %p732_p8, %p726_p5 }
  0xf8   :  { %517 = vmatpush2.msra.mxu1 %v478_v52 }
  0xf9   :  { %518 = vmatprep.subr.mxu1 %v477_v53 }
  0xfa   :  { %519 = vmatpush2.msra.mxu1 %v476_v54 }
  0xfb   :  { %520 = vmatprep.subr.mxu1 %v475_v55 }
  0xfc   :  { %521 = vmatpush2.msra.mxu1 %v474_v56 }
  0xfd   :  { %522 = vmatprep.subr.mxu1 %v473_v57 }
  0xfe   :  { %523 = vmatpush2.msra.mxu1 %v472_v58 }
  0xff   :  { %524 = vmatprep.subr.mxu1 %v471_v59 }
 0x100   :  { %525 = vmatpush2.msra.mxu1 %v470_v60 }
 0x101   :  { %526 = vmatprep.subr.mxu1 %v469_v61 }
 0x102   :  { %527 = vmatpush2.msra.mxu1 %v468_v62 }
 0x103   :  { %528 = vmatprep.subr.mxu1 %v467_v63 }
 0x104   :  { %529 = vmatpush2.msra.mxu1 %v466_v3 }
 0x105   :  { %530 = vmatprep.subr.mxu1 %v465_v4 }
 0x106   :  { %531 = vmatpush2.msra.mxu1 %v464_v5 }
 0x107   :  { %532 = vmatprep.subr.mxu1 %v463_v6 }
 0x108   :  { %533 = vmatpush2.msra.mxu1 %v462_v7 }
 0x109   :  { %534 = vmatprep.subr.mxu1 %v461_v8 }
 0x10a   :  { %535 = vmatpush2.msra.mxu1 %v460_v9 }
 0x10b   :  { %536 = vmatprep.subr.mxu1 %v459_v10 }
 0x10c   :  { %537 = vmatpush2.msra.mxu1 %v458_v11 }
 0x10d   :  { %538 = vmatprep.subr.mxu1 %v457_v12 }
 0x10e   :  { %539 = vmatpush2.msra.mxu1 %v456_v13 }
 0x10f   :  { %540 = vmatprep.subr.mxu1 %v455_v14 }
 0x110   :  { %541 = vmatpush2.msra.mxu1 %v454_v15 }
 0x111   :  { %542 = vmatprep.subr.mxu1 %v453_v16 }
 0x112   :  { %543 = vmatpush2.msra.mxu1 %v452_v17 }
 0x113   :  { %544 = vmatprep.subr.mxu1 %v451_v18 }
 0x114   :  { %545 = vmatpush2.msra.mxu1 %v450_v19 }
 0x115   :  { %547 = vmatmul.mubr.f32.vlgmr.msra.gmra.mxu1 %v827_v24  ;;  %v558_v24 = vstv %s857_s4 }
 0x195   :  { %v272_v20 = vpop.f32.mrf.mxu1 }
 0x196   :  { %v277_v26 = vadd.f32 %v272_v20, %v140_v21 }
 0x197   :  { %v274_v25 = vpop.f32.mrf.mxu1 }
 0x198   :  { %v278_v28 = vadd.f32 %v274_v25, %v141_v23 }
 0x199   :  { %v410_v22 = vpop.f32.mrf.mxu0 }
 0x19a   :  { %v415_v29 = vadd.f32 %v410_v22, %v277_v26 }
 0x19b   :  { %v412_v27 = vpop.f32.mrf.mxu0 }
 0x19c   :  { %v416_v31 = vadd.f32 %v412_v27, %v278_v28 }
 0x1d5   :  { %v548_v30 = vpop.f32.mrf.mxu1 }
 0x1d6   :  { %v553_v32 = vadd.f32 %v548_v30, %v415_v29 }
 0x1d7   :  { %v550_v33 = vpop.f32.mrf.mxu1 }
 0x1d8   :  { %v559_v34 = vmul.f32 %v558_v24, %v553_v32  ;;  %v554_v0 = vadd.f32 %v550_v33, %v416_v31  ;;  %vm556_vm1 = vcmp.ge.f32.partialorder %v553_v32, 0.0 }
 0x1da   :  { %v560_v36 = vmul.f32 %v558_v24, %v554_v0  ;;  %v561_v37 = vsel %vm556_vm1, %v553_v32, %v559_v34  ;;  %vm557_vm2 = vcmp.ge.f32.partialorder %v554_v0, 0.0 }
 0x1db   :  { %565 = vrot.lane.b32.xlu1 %v561_v37, %s751_s28  ;;  %574 = vrot.lane.b32.xlu0 %v561_v37, %s754_s3 }
 0x1dc   :  { %v562_v38 = vsel %vm557_vm2, %v554_v0, %v560_v36 }
 0x1df   :  { %567 = vrot.lane.b32.xlu1 %v562_v38, %s751_s28  ;;  %576 = vrot.lane.b32.xlu0 %v562_v38, %s754_s3 }
 0x1e3   :  { %587 = vperm.xlu0 %704, %v584_v39  }
 0x24d   :  { %v566_v40 = vpop.permute.xlu1 %565  ;;  %v575_v41 = vpop.permute.xlu0 %574 }
 0x251   :  { %v577_v42 = vpop.permute.xlu0 %576  ;;  %v568_v43 = vpop.permute.xlu1 %567 }
 0x252   :  { %v579_v44 = vsel %vm578_vm3, %v575_v41, %v577_v42  ;;  %693 = vmatprep.subr.msk.mxu0 %vm578_vm3, %v577_v42  ;;  %v570_v45 = vsel %vm569_vm4, %v566_v40, %v568_v43 }
 0x253   :  { %621 = vmatpush1.msra.mxu0 %v579_v44 }
 0x254   :  { %622 = vmatprep.subr.mxu0 %v562_v38 }
 0x255   :  { %623 = vmatpush1.msra.mxu0 %v561_v37 }
 0x256   :  { %624 = vmatprep.subr.mxu0 %v570_v45 }
 0x257   :  { %695 = vmatpush1.msk.msra.mxu0 %vm694_vm5, %v566_v40 }
 0x258   :  { %696 = vmatmul.mubr.msk.f32.vlgmr.msra.gmra.mxu0 %vm590_vm6, %v583_v46 }
 0x25e   :  { %v588_v47 = vpop.permute.xlu0 %587 }
 0x318   :  { %v660_v48 = vpop.f32.mrf.mxu0 }
 0x319   :  { %v661_v49 = vadd.f32 %v660_v48, %v588_v47 }
 0x31a   :  { %v662_v50 = vpop.f32.mrf.mxu0 }
 0x31b   :  { %v665_v51 = vadd.f32 %v661_v49, %v809_v2  ;;  %v663_v52 = vadd.f32 %v662_v50, %v588_v47 }
 0x31d   :  { %v669_v53 = vmul.f32 0.01, %v665_v51  ;;  %v666_v54 = vadd.f32 %v663_v52, %v804_v1  ;;  %vm667_vm7 = vcmp.ge.f32.partialorder %v665_v51, 0.0 }
 0x31f   :  { %v670_v55 = vmul.f32 0.01, %v666_v54  ;;  %vm668_vm8 = vcmp.ge.f32.partialorder %v666_v54, 0.0  ;;  %v671_v56 = vsel %vm667_vm7, %v665_v51, %v669_v53 }
 0x320   :  { %673 = vst [vmem:[#allocation6] sm:$0xff] %v671_v56 }
 0x321   :  { %v672_v57 = vsel %vm668_vm8, %v666_v54, %v670_v55 }
 0x322   :  { %674 = vst [vmem:[#allocation6 + $0x8] sm:$0xff] %v672_v57 }
 0x323   :  { %736 = shalt.err (!%p733_p9)
}
 0x324   :  { %684 = dma.vmem_to_hbm [thread:$0]  %s682_s24, 256, %s860_s7, [#allocation5]  }
 0x325   :  { %747 = dma.done.wait [#allocation5], 256  }
 0x326   :  { %748 = vsyncadd [#allocation5], 4294967040 }
 0x327   :  { %688 = vsyncpa [#allocation4], 1 }
 0x328   :  { %689 = vsyncpa [#allocation5], 1 }

</bundles_post_ra>
